<compile_context>
chip_gen: v7x
topology: tpu7x:2x2x1
jax: 0.10.0
libtpu: 0.0.40
codegen_flags: <defaults>
</compile_context>

<pallas_src>
import functools
import math

import jax
import jax.numpy as jnp
from jax.experimental import pallas as pl
from jax.experimental.pallas import tpu as pltpu


def _round_up(x, m):
    return (x + m - 1) // m * m


def pointnet_kernel(x_ref,
                    w1_ref, b1_ref,
                    w2_ref, b2_ref,
                    w3_ref, b3_ref,
                    w4_ref, b4_ref,
                    o_ref, *, last_tile_valid_rows):
    """One (batch, point-tile) step: 4 fused 1x1-conv+BN layers + running max."""
    n_idx = pl.program_id(1)
    n_last = pl.num_programs(1) - 1
    tile_n, c_in = x_ref.shape

    x = x_ref[...]                                   # (tile_n, c_in) f32
    w1 = w1_ref[...]                                 # (c_in, 64)    f32

    # ---- layer 1: conv1(k=1) + bn1 folded.  K = c_in is tiny -> VPU FMAs
    # (keeps the vex/MXU push slots free for layers 2-4). ----
    h = x[:, 0:1] * w1[0:1, :] + b1_ref[...]
    for c in range(1, c_in):
        h = h + x[:, c:c + 1] * w1[c:c + 1, :]
    h = jnp.maximum(h, 0.0)

    # ---- layers 2-3: bf16 MXU matmuls, f32 accumulation + folded bias + relu. ----
    h = jnp.dot(h.astype(jnp.bfloat16), w2_ref[...],
                preferred_element_type=jnp.float32) + b2_ref[...]
    h = jnp.maximum(h, 0.0)
    h = jnp.dot(h.astype(jnp.bfloat16), w3_ref[...],
                preferred_element_type=jnp.float32) + b3_ref[...]
    h = jnp.maximum(h, 0.0)

    # ---- layer 4: bf16 MXU matmul + folded bias (no relu). ----
    h = jnp.dot(h.astype(jnp.bfloat16), w4_ref[...],
                preferred_element_type=jnp.float32) + b4_ref[...]

    # ---- running max across point tiles  ==  torch.max(x, 2)[0] ----
    @pl.when(n_idx == 0)
    def _():
        o_ref[...] = jnp.full(o_ref.shape, -jnp.inf, dtype=o_ref.dtype)

    if last_tile_valid_rows == tile_n:
        # No N-padding: every row of every tile is valid -> never mask.
        o_ref[...] = jnp.maximum(o_ref[...],
                                 jnp.max(h, axis=0, keepdims=True)[None])
    else:
        # Only the final point tile contains padded rows.  Interior tiles skip
        # the mask entirely; the last tile uses a (tile_n, 1) mask column
        # (layer 4 has no ReLU so padded zeros would corrupt the max).
        @pl.when(n_idx != n_last)
        def _():
            o_ref[...] = jnp.maximum(o_ref[...],
                                     jnp.max(h, axis=0, keepdims=True)[None])

        @pl.when(n_idx == n_last)
        def _():
            row = jax.lax.broadcasted_iota(jnp.int32, (tile_n, 1), 0)
            hm = jnp.where(row < last_tile_valid_rows, h, -jnp.inf)
            o_ref[...] = jnp.maximum(o_ref[...],
                                     jnp.max(hm, axis=0, keepdims=True)[None])


def pointnet_encoder(x, params, *, tile_n_max=4096):
    """x: (B, N, input_dim) f32  ->  (B, latent_dim) f32 (eval-mode BN)."""
    B, N, C_in = x.shape
    (w1, b1), (w2, b2), (w3, b3), (w4, b4) = params
    latent_dim = w4.shape[1]

    # Balanced point tiles: fewest grid steps with minimal padding waste.
    # tile_n_max ~4K keeps the live set (double-buffered x tile + f32/bf16
    # activations) ~10 MiB: fits v5e/v6e/v7x VMEM with headroom.
    n_tiles = max(1, math.ceil(N / tile_n_max))
    tile_n = _round_up(math.ceil(N / n_tiles), 8)
    n_pad = tile_n * n_tiles
    if n_pad != N:
        x = jnp.pad(x, ((0, 0), (0, n_pad - N), (0, 0)))

    # Lane-dense output: pad latent channels to 128 (sliced back afterwards).
    lat_pad = _round_up(latent_dim, 128)
    w4p = jnp.pad(w4, ((0, 0), (0, lat_pad - latent_dim)))
    b4p = jnp.pad(b4, ((0, 0), (0, lat_pad - latent_dim)))

    # bf16 operands for the MXU layers (layer-1 weight stays f32: VPU path).
    w2b = w2.astype(jnp.bfloat16)
    w3b = w3.astype(jnp.bfloat16)
    w4b = w4p.astype(jnp.bfloat16)

    def const_spec(arr):
        # Small parameter array fully resident in VMEM for every grid step.
        return pl.BlockSpec(arr.shape, lambda b, n: (0, 0))

    grid_spec = pltpu.PrefetchScalarGridSpec(
        num_scalar_prefetch=0,
        grid=(B, n_tiles),
        in_specs=[
            pl.BlockSpec((None, tile_n, C_in), lambda b, n: (b, n, 0)),
            const_spec(w1), const_spec(b1),
            const_spec(w2b), const_spec(b2),
            const_spec(w3b), const_spec(b3),
            const_spec(w4b), const_spec(b4p),
        ],
        out_specs=pl.BlockSpec((1, 1, lat_pad), lambda b, n: (b, 0, 0)),
    )

    last_valid = N - (n_tiles - 1) * tile_n   # rows of the final tile that are real

    out = pl.pallas_call(
        functools.partial(pointnet_kernel, last_tile_valid_rows=last_valid),
        out_shape=jax.ShapeDtypeStruct((B, 1, lat_pad), jnp.float32),
        grid_spec=grid_spec,
        compiler_params=pltpu.CompilerParams(
            dimension_semantics=("parallel", "arbitrary"),
            vmem_limit_bytes=48 * 1024 * 1024),
    )(x, w1, b1, w2b, b2, w3b, b3, w4b, b4p)

    return out[:, 0, :latent_dim]


def make_params(key, input_dim=2, latent_dim=3):
    """Deterministic synthetic params; eval-mode BN folded into weights/bias."""
    dims = [(input_dim, 64), (64, 64), (64, 128), (128, latent_dim)]
    eps = 1e-5
    params = []
    for cin, cout in dims:
        key, k_w, k_cb, k_g, k_be, k_m, k_v = jax.random.split(key, 7)
        w = 0.1 * jax.random.normal(k_w, (cin, cout), jnp.float32)     # (C_in, C_out)
        conv_b = 0.1 * jax.random.normal(k_cb, (cout,), jnp.float32)
        gamma = 1.0 + 0.1 * jax.random.normal(k_g, (cout,), jnp.float32)
        beta = 0.1 * jax.random.normal(k_be, (cout,), jnp.float32)
        mean = 0.1 * jax.random.normal(k_m, (cout,), jnp.float32)
        var = jnp.abs(jax.random.normal(k_v, (cout,), jnp.float32)) + 0.5
        scale = gamma / jnp.sqrt(var + eps)
        w_fold = w * scale[None, :]                  # fold BN scale into W
        b_fold = beta + (conv_b - mean) * scale      # folded bias
        params.append((w_fold, b_fold.reshape(1, cout)))
    return params


def reference_forward(x, params):
    """Plain-JAX f32 reference matching the PyTorch eval-mode forward."""
    h = x
    for i, (w, b) in enumerate(params):
        h = jnp.einsum("bnc,cd->bnd", h, w) + b
        if i < 3:
            h = jnp.maximum(h, 0.0)
    return jnp.max(h, axis=1)


if __name__ == "__main__":
    key = jax.random.PRNGKey(0)
    k_x, k_p, k_x2 = jax.random.split(key, 3)

    B, N, input_dim, latent_dim = 2, 16, 2, 3
    params = make_params(k_p, input_dim=input_dim, latent_dim=latent_dim)

    # Small shape: single point tile, no padding (unmasked static path).
    x = jax.random.normal(k_x, (B, N, input_dim), jnp.float32)
    out = jax.block_until_ready(pointnet_encoder(x, params))
    ref = reference_forward(x, params)
    assert out.shape == (B, latent_dim)
    assert jnp.allclose(out, ref, atol=2e-2, rtol=2e-2)   # bf16 matmul tolerance

    # Larger N: single balanced tile with a few padded rows (masked last tile).
    N2 = 2500
    x2 = jax.random.normal(k_x2, (B, N2, input_dim), jnp.float32)
    out2 = jax.block_until_ready(pointnet_encoder(x2, params))
    ref2 = reference_forward(x2, params)
    assert out2.shape == (B, latent_dim)
    assert jnp.allclose(out2, ref2, atol=2e-2, rtol=2e-2)

    # Force multiple point tiles to exercise the VMEM-resident running max.
    out3 = jax.block_until_ready(pointnet_encoder(x2, params, tile_n_max=1024))
    assert jnp.allclose(out3, ref2, atol=2e-2, rtol=2e-2)

    print("KERNEL_OK")
</pallas_src>

<mosaic_0001>
module attributes {stable_mosaic.version = 11 : i64} {
  func.func @pointnet_kernel(%arg0: i32, %arg1: i32, %arg2: memref<1x16x2xf32, #tpu.memory_space<vmem>>, %arg3: memref<2x64xf32, #tpu.memory_space<vmem>>, %arg4: memref<1x64xf32, #tpu.memory_space<vmem>>, %arg5: memref<64x64xbf16, #tpu.memory_space<vmem>>, %arg6: memref<1x64xf32, #tpu.memory_space<vmem>>, %arg7: memref<64x128xbf16, #tpu.memory_space<vmem>>, %arg8: memref<1x128xf32, #tpu.memory_space<vmem>>, %arg9: memref<128x128xbf16, #tpu.memory_space<vmem>>, %arg10: memref<1x128xf32, #tpu.memory_space<vmem>>, %arg11: memref<1x1x128xf32, #tpu.memory_space<vmem>>) attributes {dimension_semantics = [#tpu.dimension_semantics<parallel>, #tpu.dimension_semantics<arbitrary>], iteration_bounds = array<i64: 2, 1>, scalar_prefetch = 0 : i64, scratch_operands = 0 : i64, tpu.core_type = #tpu.core_type<tc>, window_params = [{transform_indices = @transform_0, window_bounds = array<i64: 1, 16, 2>}, {pipeline_mode = #tpu.pipeline_mode<synchronous>, transform_indices = @transform_1, window_bounds = array<i64: 2, 64>}, {pipeline_mode = #tpu.pipeline_mode<synchronous>, transform_indices = @transform_2, window_bounds = array<i64: 1, 64>}, {pipeline_mode = #tpu.pipeline_mode<synchronous>, transform_indices = @transform_3, window_bounds = array<i64: 64, 64>}, {pipeline_mode = #tpu.pipeline_mode<synchronous>, transform_indices = @transform_4, window_bounds = array<i64: 1, 64>}, {pipeline_mode = #tpu.pipeline_mode<synchronous>, transform_indices = @transform_5, window_bounds = array<i64: 64, 128>}, {pipeline_mode = #tpu.pipeline_mode<synchronous>, transform_indices = @transform_6, window_bounds = array<i64: 1, 128>}, {pipeline_mode = #tpu.pipeline_mode<synchronous>, transform_indices = @transform_7, window_bounds = array<i64: 128, 128>}, {pipeline_mode = #tpu.pipeline_mode<synchronous>, transform_indices = @transform_8, window_bounds = array<i64: 1, 128>}, {transform_indices = @transform_9, window_bounds = array<i64: 1, 1, 128>}]} {
    %c0 = arith.constant 0 : index
    %c0_0 = arith.constant 0 : index
    %c0_1 = arith.constant 0 : index
    %0 = vector.load %arg2[%c0, %c0_0, %c0_1] : memref<1x16x2xf32, #tpu.memory_space<vmem>>, vector<1x16x2xf32>
    %1 = vector.shape_cast %0 : vector<1x16x2xf32> to vector<16x2xf32>
    %c0_2 = arith.constant 0 : index
    %c0_3 = arith.constant 0 : index
    %2 = vector.load %arg3[%c0_2, %c0_3] : memref<2x64xf32, #tpu.memory_space<vmem>>, vector<2x64xf32>
    %3 = vector.extract_strided_slice %1 {offsets = [0, 0], sizes = [16, 1], strides = [1, 1]} : vector<16x2xf32> to vector<16x1xf32>
    %4 = vector.extract_strided_slice %2 {offsets = [0, 0], sizes = [1, 64], strides = [1, 1]} : vector<2x64xf32> to vector<1x64xf32>
    %5 = vector.broadcast %3 : vector<16x1xf32> to vector<16x64xf32>
    %6 = vector.broadcast %4 : vector<1x64xf32> to vector<16x64xf32>
    %7 = arith.mulf %5, %6 : vector<16x64xf32>
    %c0_4 = arith.constant 0 : index
    %c0_5 = arith.constant 0 : index
    %8 = vector.load %arg4[%c0_4, %c0_5] : memref<1x64xf32, #tpu.memory_space<vmem>>, vector<1x64xf32>
    %9 = vector.broadcast %8 : vector<1x64xf32> to vector<16x64xf32>
    %10 = arith.addf %7, %9 : vector<16x64xf32>
    %11 = vector.extract_strided_slice %1 {offsets = [0, 1], sizes = [16, 1], strides = [1, 1]} : vector<16x2xf32> to vector<16x1xf32>
    %12 = vector.extract_strided_slice %2 {offsets = [1, 0], sizes = [1, 64], strides = [1, 1]} : vector<2x64xf32> to vector<1x64xf32>
    %13 = vector.broadcast %11 : vector<16x1xf32> to vector<16x64xf32>
    %14 = vector.broadcast %12 : vector<1x64xf32> to vector<16x64xf32>
    %15 = arith.mulf %13, %14 : vector<16x64xf32>
    %16 = arith.addf %10, %15 : vector<16x64xf32>
    %cst = arith.constant 0.000000e+00 : f32
    %17 = vector.broadcast %cst : f32 to vector<16x64xf32>
    %18 = arith.maximumf %16, %17 : vector<16x64xf32>
    %19 = arith.truncf %18 : vector<16x64xf32> to vector<16x64xbf16>
    %c0_6 = arith.constant 0 : index
    %c0_7 = arith.constant 0 : index
    %20 = vector.load %arg5[%c0_6, %c0_7] : memref<64x64xbf16, #tpu.memory_space<vmem>>, vector<64x64xbf16>
    %cst_8 = arith.constant dense<0.000000e+00> : vector<16x64xf32>
    %21 = tpu.matmul %19, %20, %cst_8 {dimension_numbers = #tpu.dot_dimension_numbers<[1], [0], [0], [1], [0, 0, 1, 1], [], []>} : vector<16x64xbf16>, vector<64x64xbf16>, vector<16x64xf32> -> vector<16x64xf32>
    %c0_9 = arith.constant 0 : index
    %c0_10 = arith.constant 0 : index
    %22 = vector.load %arg6[%c0_9, %c0_10] : memref<1x64xf32, #tpu.memory_space<vmem>>, vector<1x64xf32>
    %23 = vector.broadcast %22 : vector<1x64xf32> to vector<16x64xf32>
    %24 = arith.addf %21, %23 : vector<16x64xf32>
    %cst_11 = arith.constant 0.000000e+00 : f32
    %25 = vector.broadcast %cst_11 : f32 to vector<16x64xf32>
    %26 = arith.maximumf %24, %25 : vector<16x64xf32>
    %27 = arith.truncf %26 : vector<16x64xf32> to vector<16x64xbf16>
    %c0_12 = arith.constant 0 : index
    %c0_13 = arith.constant 0 : index
    %28 = vector.load %arg7[%c0_12, %c0_13] : memref<64x128xbf16, #tpu.memory_space<vmem>>, vector<64x128xbf16>
    %cst_14 = arith.constant dense<0.000000e+00> : vector<16x128xf32>
    %29 = tpu.matmul %27, %28, %cst_14 {dimension_numbers = #tpu.dot_dimension_numbers<[1], [0], [0], [1], [0, 0, 1, 1], [], []>} : vector<16x64xbf16>, vector<64x128xbf16>, vector<16x128xf32> -> vector<16x128xf32>
    %c0_15 = arith.constant 0 : index
    %c0_16 = arith.constant 0 : index
    %30 = vector.load %arg8[%c0_15, %c0_16] : memref<1x128xf32, #tpu.memory_space<vmem>>, vector<1x128xf32>
    %31 = vector.broadcast %30 : vector<1x128xf32> to vector<16x128xf32>
    %32 = arith.addf %29, %31 : vector<16x128xf32>
    %cst_17 = arith.constant 0.000000e+00 : f32
    %33 = vector.broadcast %cst_17 : f32 to vector<16x128xf32>
    %34 = arith.maximumf %32, %33 : vector<16x128xf32>
    %35 = arith.truncf %34 : vector<16x128xf32> to vector<16x128xbf16>
    %c0_18 = arith.constant 0 : index
    %c0_19 = arith.constant 0 : index
    %36 = vector.load %arg9[%c0_18, %c0_19] : memref<128x128xbf16, #tpu.memory_space<vmem>>, vector<128x128xbf16>
    %cst_20 = arith.constant dense<0.000000e+00> : vector<16x128xf32>
    %37 = tpu.matmul %35, %36, %cst_20 {dimension_numbers = #tpu.dot_dimension_numbers<[1], [0], [0], [1], [0, 0, 1, 1], [], []>} : vector<16x128xbf16>, vector<128x128xbf16>, vector<16x128xf32> -> vector<16x128xf32>
    %c0_21 = arith.constant 0 : index
    %c0_22 = arith.constant 0 : index
    %38 = vector.load %arg10[%c0_21, %c0_22] : memref<1x128xf32, #tpu.memory_space<vmem>>, vector<1x128xf32>
    %39 = vector.broadcast %38 : vector<1x128xf32> to vector<16x128xf32>
    %40 = arith.addf %37, %39 : vector<16x128xf32>
    %c0_i32 = arith.constant 0 : i32
    %41 = arith.cmpi eq, %arg1, %c0_i32 : i32
    %42 = arith.extui %41 : i1 to i32
    %c0_i32_23 = arith.constant 0 : i32
    %43 = arith.cmpi ne, %42, %c0_i32_23 : i32
    scf.if %43 {
      %cst_31 = arith.constant 0xFF800000 : f32
      %50 = vector.broadcast %cst_31 : f32 to vector<1x1x128xf32>
      %c0_32 = arith.constant 0 : index
      %c0_33 = arith.constant 0 : index
      %c0_34 = arith.constant 0 : index
      %51 = vector.load %arg11[%c0_32, %c0_33, %c0_34] : memref<1x1x128xf32, #tpu.memory_space<vmem>>, vector<1x1x128xf32>
      tpu.vector_store %arg11[%c0_32, %c0_33, %c0_34], %50 {strides = array<i32>} : memref<1x1x128xf32, #tpu.memory_space<vmem>>, vector<1x1x128xf32>,
    } else {
    }
    %c0_24 = arith.constant 0 : index
    %c0_25 = arith.constant 0 : index
    %c0_26 = arith.constant 0 : index
    %44 = vector.load %arg11[%c0_24, %c0_25, %c0_26] : memref<1x1x128xf32, #tpu.memory_space<vmem>>, vector<1x1x128xf32>
    %cst_27 = arith.constant dense<0xFF800000> : vector<128xf32>
    %45 = vector.multi_reduction <maximumf>, %40, %cst_27 [0] : vector<16x128xf32> to vector<128xf32>
    %46 = vector.shape_cast %45 : vector<128xf32> to vector<1x128xf32>
    %47 = vector.shape_cast %46 : vector<1x128xf32> to vector<1x1x128xf32>
    %48 = arith.maximumf %44, %47 : vector<1x1x128xf32>
    %c0_28 = arith.constant 0 : index
    %c0_29 = arith.constant 0 : index
    %c0_30 = arith.constant 0 : index
    %49 = vector.load %arg11[%c0_28, %c0_29, %c0_30] : memref<1x1x128xf32, #tpu.memory_space<vmem>>, vector<1x1x128xf32>
    tpu.vector_store %arg11[%c0_28, %c0_29, %c0_30], %48 {strides = array<i32>} : memref<1x1x128xf32, #tpu.memory_space<vmem>>, vector<1x1x128xf32>,
    return
  }
  func.func @transform_0(%arg0: i32, %arg1: i32) -> (i32, i32, i32) {
    %c0_i32 = arith.constant 0 : i32
    %c0_i32_0 = arith.constant 0 : i32
    return %arg0, %arg1, %c0_i32 : i32, i32, i32
  }
  func.func @transform_1(%arg0: i32, %arg1: i32) -> (i32, i32) {
    %c0_i32 = arith.constant 0 : i32
    %c0_i32_0 = arith.constant 0 : i32
    %c0_i32_1 = arith.constant 0 : i32
    return %c0_i32, %c0_i32_0 : i32, i32
  }
  func.func @transform_2(%arg0: i32, %arg1: i32) -> (i32, i32) {
    %c0_i32 = arith.constant 0 : i32
    %c0_i32_0 = arith.constant 0 : i32
    %c0_i32_1 = arith.constant 0 : i32
    return %c0_i32, %c0_i32_0 : i32, i32
  }
  func.func @transform_3(%arg0: i32, %arg1: i32) -> (i32, i32) {
    %c0_i32 = arith.constant 0 : i32
    %c0_i32_0 = arith.constant 0 : i32
    %c0_i32_1 = arith.constant 0 : i32
    return %c0_i32, %c0_i32_0 : i32, i32
  }
  func.func @transform_4(%arg0: i32, %arg1: i32) -> (i32, i32) {
    %c0_i32 = arith.constant 0 : i32
    %c0_i32_0 = arith.constant 0 : i32
    %c0_i32_1 = arith.constant 0 : i32
    return %c0_i32, %c0_i32_0 : i32, i32
  }
  func.func @transform_5(%arg0: i32, %arg1: i32) -> (i32, i32) {
    %c0_i32 = arith.constant 0 : i32
    %c0_i32_0 = arith.constant 0 : i32
    %c0_i32_1 = arith.constant 0 : i32
    return %c0_i32, %c0_i32_0 : i32, i32
  }
  func.func @transform_6(%arg0: i32, %arg1: i32) -> (i32, i32) {
    %c0_i32 = arith.constant 0 : i32
    %c0_i32_0 = arith.constant 0 : i32
    %c0_i32_1 = arith.constant 0 : i32
    return %c0_i32, %c0_i32_0 : i32, i32
  }
  func.func @transform_7(%arg0: i32, %arg1: i32) -> (i32, i32) {
    %c0_i32 = arith.constant 0 : i32
    %c0_i32_0 = arith.constant 0 : i32
    %c0_i32_1 = arith.constant 0 : i32
    return %c0_i32, %c0_i32_0 : i32, i32
  }
  func.func @transform_8(%arg0: i32, %arg1: i32) -> (i32, i32) {
    %c0_i32 = arith.constant 0 : i32
    %c0_i32_0 = arith.constant 0 : i32
    %c0_i32_1 = arith.constant 0 : i32
    return %c0_i32, %c0_i32_0 : i32, i32
  }
  func.func @transform_9(%arg0: i32, %arg1: i32) -> (i32, i32, i32) {
    %c0_i32 = arith.constant 0 : i32
    %c0_i32_0 = arith.constant 0 : i32
    %c0_i32_1 = arith.constant 0 : i32
    return %arg0, %c0_i32, %c0_i32_0 : i32, i32, i32
  }
}

</mosaic_0001>

<bundles_post_ra>
// kernel: tpu_custom_call.1
= control target key start
LH: loop header
LB: loop body
LE: loop exit
PB: predicated region body
PF: predicated region fallthrough
CT: control target
= control target key end

     0   :  { %14 = vsyncpa [#allocation3], 0  ;;  %s1484_s0 = inlined_call_operand.vmem [shape: f32[2,16,2], index: 0, kind: input, shape index: {}]   ;;  %s1485_s1 = inlined_call_operand.vmem [shape: f32[2,64], index: 1, kind: input, shape index: {}]   ;;  %s1486_s2 = inlined_call_operand.vmem [shape: f32[1,64], index: 2, kind: input, shape index: {}]   ;;  %s1487_s3 = inlined_call_operand.vmem [shape: bf16[64,64], index: 3, kind: input, shape index: {}]   ;;  %s1488_s4 = inlined_call_operand.vmem [shape: f32[1,64], index: 4, kind: input, shape index: {}]   ;;  %s1489_s5 = inlined_call_operand.hbm [shape: bf16[64,128], index: 5, kind: input, shape index: {}]   ;;  %s1490_s6 = inlined_call_operand.vmem [shape: f32[1,128], index: 6, kind: input, shape index: {}]   ;;  %s1491_s7 = inlined_call_operand.hbm [shape: bf16[128,128], index: 7, kind: input, shape index: {}]   ;;  %s1492_s8 = inlined_call_operand.vmem [shape: f32[1,128], index: 8, kind: input, shape index: {}]   ;;  %s1493_s9 = inlined_call_operand.hbm [shape: f32[2,1,128], index: 9, kind: output, shape index: {}]  }
   0x1   :  { %15 = vsyncpa [#allocation6], 0 }
   0x2   :  { %16 = vsyncpa [#allocation4], 0 }
   0x3   :  { %18 = vsyncpa [#allocation4 + $0x1], 0  ;;  %s1246_s30 = smov 0   ;;  %s1248_s10 = smov 0  }
   0x4   :  { %s1250_s11 = smov 0   ;;  %s1252_s12 = smov 0  }
   0x5   :  { %s1254_s13 = smov 0   ;;  %s1256_s14 = smov 0  }
   0x6 LB: > { %1502 = sst [smem:[#allocation11_spill]] %s1172_s11  ;;  %s840_s15 = sadd.s32 4294967295, %s1184_s14   ;;  %s1184_s14 = sphi %s1256_s14, %s24_s14   ;;  %s1180_s13 = sphi %s1254_s13, %s1520_s13   ;;  %s1176_s12 = sphi %s1252_s12, %s1519_s12   ;;  %s1172_s11 = sphi %s1250_s11, %s1518_s11   ;;  %s1168_s10 = sphi %s1248_s10, %s1522_s10   ;;  %s1164_s30 = sphi %s1246_s30, %s1521_s30  }
   0x7   : > { %1503 = sst [smem:[#allocation12_spill]] %s1180_s13  ;;  %s841_s16 = sadd.s32 4294967294, %s1184_s14  }
   0x8   : > { %s36_s17 = sadd.s32 1, %s1180_s13  ;;  %s239_s18 = sadd.s32 1, %s1172_s11 }
   0x9   : > { %p38_p0 = scmp.ge.s32.totalorder %s36_s17, 2  ;;  %p249_p1 = scmp.ne.s32.totalorder %s1172_s11, %s1168_s10 }
   0xa   : > { %p250_p2 = scmp.eq.s32.totalorder %s840_s15, 1  ;;  %p255_p3 = scmp.ne.s32.totalorder %s1168_s10, %s1164_s30 }
   0xb   : > { %s1524_s17 = smov (%p38_p0, %s36_s17), 0  ;;  %p256_p5 = scmp.eq.s32.totalorder %s841_s16, 1 }
   0xc   : > { %1504 = sst [smem:[#allocation13_spill]] %s1524_s17  ;;  %p1286_p4 = por %p250_p2, %p249_p1 }
   0xd   : > { %s236_s20 = ssub.s32 %s1180_s13, %s1524_s17  ;;  %p842_p6 = scmp.ge.s32.totalorder %s1184_s14, 1 }
   0xe   : > { %s1505_s19 = scalar_select %p1286_p4, 1, 0 }
   0xf   : > { %p237_p7 = scmp.eq.s32.totalorder %s236_s20, 0  ;;  %p1293_p8 = por %p256_p5, %p255_p3 }
  0x10   : > { %p263_p9 = scmp.lt.s32.totalorder %s1184_s14, 3  ;;  %p1305_p11 = scmp.eq.s32.totalorder %s840_s15, 0 }
  0x11   : > { %s1506_s21 = scalar_select %p1293_p8, 1, 0 }
  0x12   : > { %s1299_s22 = scalar_select %p237_p7, %s1172_s11, %s239_s18  }
  0x13   : > { %1507 = sst [smem:[#allocation14_spill]] %s1506_s21  ;;  %p1301_p10 = pnand %p842_p6, %p263_p9 }
  0x14   : > { %1508 = sst [smem:[#allocation15_spill]] %s1299_s22  ;;  %s1186_s25 = smov [#allocation2]  }
  0x15   : > { %s1509_s23 = scalar_select %p1301_p10, 1, 0 }
  0x16   : > { %s1510_s24 = scalar_select %p1305_p11, 1, 0 }
  0x17   : > { %p950_p12 = pneg %p1301_p10  ;;  %s287_s26 = sshll.u32 %s1186_s25, 4  ;;  %s288_s26 = int_to_ptr.vmem [resolvable:$true] %s287_s26 }
  0x18   : > { %s1187_s28 = smov [#allocation5]   ;;  %s1042_s18 = scalar_lea.hbm %s1489_s5, 512 }
  0x19   : > { %p1313_p13 = pnand %p1305_p11, %p950_p12  ;;  %s303_s29 = sshll.u32 %s1187_s28, 4  ;;  %s1317_s29 = int_to_ptr.vmem [resolvable:$true] %s303_s29 }
  0x1a   : > { %p1043_p0 = scmp.ne.s32.totalorder %s1489_s5, %s1042_s18  ;;  %p1049_p5 = scmp.lt.u32.totalorder %s1042_s18, %s1489_s5 }
  0x1b   : > { %p1044_p1 = pneg %p1313_p13 }
  0x1d   : > { %p1045_p2 = pnand %p1044_p1, %p1043_p0 }
  0x1f   : > { %p1046_p3 = pneg %p1045_p2 }
  0x21   : > { %p1051_p6 = pnand %p1049_p5, %p1046_p3 }
  0x23   : > { %1054 = shalt.err (!%p1051_p6)
}
  0x24   : > { %s1055_s28 = scalar_lea.vmem %s288_s26, 512  ;;  %p1063_p8 = scmp.lt.s32.totalorder %s288_s26, %s288_s26 }
  0x25   : > { %p1056_p7 = scmp.ne.s32.totalorder %s288_s26, %s1055_s28  ;;  %p1064_p4 = scmp.lt.s32.totalorder %s1055_s28, %s1055_s28 }
  0x27   : > { %p1058_p9 = pnand %p1056_p7, %p1044_p1  ;;  %p1065_p11 = por %p1064_p4, %p1063_p8 }
  0x29   : > { %p1059_p12 = pneg %p1058_p9 }
  0x2b   : > { %p1066_p10 = pnand %p1065_p11, %p1059_p12 }
  0x2d   : > { %1069 = shalt.err (!%p1066_p10)
}
  0x2e   : > { %s1188_s17 = smov 64   ;;  %s1189_s15 = smov 4  }
  0x2f   : > { %953 = dma.hbm_to_vmem [thread:$0]  (!%p1313_p13), %s1489_s5, 512, %s288_s26, [#allocation3], %s1188_s17, %s1188_s17, %s1189_s15  }
  0x30   : > { %s1070_s25 = scalar_lea.hbm %s1491_s7, 1024 }
  0x31   : > { %p1071_p0 = scmp.ne.s32.totalorder %s1491_s7, %s1070_s25  ;;  %p1077_p10 = scmp.lt.u32.totalorder %s1070_s25, %s1491_s7 }
  0x33   : > { %p1073_p4 = pnand %p1071_p0, %p1044_p1 }
  0x35   : > { %p1074_p8 = pneg %p1073_p4 }
  0x37   : > { %p1079_p11 = pnand %p1077_p10, %p1074_p8 }
  0x39   : > { %1082 = shalt.err (!%p1079_p11)
}
  0x3a   : > { %s1083_s26 = scalar_lea.vmem %s1317_s29, 1024  ;;  %p1091_p6 = scmp.lt.s32.totalorder %s1317_s29, %s1317_s29 }
  0x3b   : > { %p1084_p2 = scmp.ne.s32.totalorder %s1317_s29, %s1083_s26  ;;  %p1092_p7 = scmp.lt.s32.totalorder %s1083_s26, %s1083_s26 }
  0x3d   : > { %p1086_p3 = pnand %p1084_p2, %p1044_p1  ;;  %p1093_p9 = por %p1092_p7, %p1091_p6 }
  0x3f   : > { %p1087_p5 = pneg %p1086_p3 }
  0x41   : > { %p1094_p12 = pnand %p1093_p9, %p1087_p5 }
  0x43   : > { %1097 = shalt.err (!%p1094_p12)
}
  0x44   : > { %956 = dma.hbm_to_vmem [thread:$0]  (!%p1313_p13), %s1491_s7, 1024, %s1317_s29, [#allocation6], %s1188_s17, %s1188_s17, %s1189_s15  }
  0x45   : > { %p1512_p0 = scmp.ne.s32.totalorder %s1509_s23, 0 }
  0x46   : > { %p1513_p4 = scmp.ne.s32.totalorder (!%p1512_p0), %s1510_s24, 0 }
  0x47   : > { %335 = sbr.rel (%p1512_p0) target bundleno = 916 (0x394), region = 56 }
  0x4e   : > { %1151 = dma.done.wait (%p1513_p4), [#allocation3], 512  }
  0x4f   : > { %1153 = vsyncadd (%p1513_p4), [#allocation3], 4294966784 }
  0x50   : > { %1155 = dma.done.wait (%p1513_p4), [#allocation6], 1024  }
  0x51   : > { %1157 = vsyncadd (%p1513_p4), [#allocation6], 4294966272  ;;  %p379_p1 = scmp.lt.s32.totalorder %s1176_s12, 1  ;;  %v1190_v0 = vmov 1   ;;  %v1191_v1 = vmov 0   ;;  %v1192_v2 = vmov 0.0   ;;  %v402_v9 = vlaneseq }
  0x52   : > { %1024 = vset.pattern.permute.xlu1 %v1190_v0  ;;  %1023 = vset.pattern.permute.xlu0 %v1191_v1  ;;  %v1026_v4 = vld [vmem:[%s1487_s3] sm:$0xff]   ;;  %v1027_v6 = vld [vmem:[%s1487_s3 + $0x8] sm:$0xff]   ;;  %v1028_v7 = vld [vmem:[%s1487_s3 + $0x10] sm:$0xff]   ;;  %vm1193_vm0 = vmmov 0   ;;  %vm475_vm1 = vcmask 523264   ;;  %s376_s24 = sand.u32 1, %s1168_s10  }
  0x53   : > { %s380_s22 = scalar_select %p379_p1, %s1176_s12, 1  ;;  %896 = vmatprep.subr.bf16.mxu1 %v1192_v2  ;;  %920 = vmatprep.subr.bf16.mxu0 %v1192_v2  ;;  %v1029_v8 = vld [vmem:[%s1487_s3 + $0x18] sm:$0xff]   ;;  %v403_v10 = vshrl.u32 %v402_v9, 7  ;;  %v391_v12 = vld [vmem:[%s1485_s1] sm:$0x3]  ;;  %v1031_v33 = vld [vmem:[#allocation2 + $0x8] sm:$0xff]  }
  0x54   : > { %897 = vmatpush3.bf16.msra.mxu1 %v1026_v4  ;;  %904 = vmatprep.mubr.msk.bf16.mxu1 %vm1193_vm0, %v1192_v2  ;;  %v851_v17 = vld [vmem:[%s1486_s2] ss:$0 sm:$0xff]  ;;  %v1032_v34 = vld [vmem:[#allocation2 + $0x10] sm:$0xff]   ;;  %v1033_v35 = vld [vmem:[#allocation2 + $0x18] sm:$0xff]   ;;  %s377_s15 = scalar_lea.vmem [#allocation7], %s376_s24  ;;  %s873_s18 = sshll.u32 %s1176_s12, 4 }
  0x55   : > { %s876_s23 = sshll.u32 %s380_s22, 4  ;;  %898 = vmatprep.subr.bf16.mxu1 %v1192_v2  ;;  %936 = vmatprep.mubr.msk.bf16.mxu0 %vm1193_vm0, %v1192_v2  ;;  %v404_v11 = vsub.s32 0, %v403_v10  ;;  %v427_v13 = vsub.s32 1, %v403_v10  ;;  %v1030_v31 = vld [vmem:[#allocation2] sm:$0xff]   ;;  %v1035_v37 = vld [vmem:[#allocation5 + $0x8] sm:$0xff]   ;;  %v1036_v38 = vld [vmem:[#allocation5 + $0x10] sm:$0xff]   ;;  %s1437_s26 = scalar_lea.hbm %s1493_s9, %s873_s18 }
  0x56   : > { %s386_s17 = scalar_lea.vmem %s1484_s0, %s876_s23  ;;  %v1034_v36 = vld [vmem:[#allocation5] sm:$0xff]   ;;  %v1037_v39 = vld [vmem:[#allocation5 + $0x18] sm:$0xff]   ;;  %v1039_v41 = vld [vmem:[#allocation5 + $0x28] sm:$0xff]   ;;  %s749_s20 = sshll.u32 %s377_s15, 4  ;;  %s1439_s20 = int_to_ptr.vmem [resolvable:$true] %s749_s20 }
  0x57   : > { %v389_v3 = vld [vmem:[%s386_s17] sm:$0xff]  ;;  %v390_v5 = vld [vmem:[%s386_s17 + $0x8] sm:$0xff]  ;;  %v405_v14 = vrot.slane %v391_v12, %v404_v11  ;;  %v428_v15 = vrot.slane %v391_v12, %v427_v13  ;;  %921 = vmatpush3.bf16.msra.mxu0 %v1034_v36  ;;  %v1040_v52 = vld [vmem:[#allocation5 + $0x30] sm:$0xff]   ;;  %s737_s11 = scalar_lea.sflag [#allocation4], %s376_s24  ;;  %s1098_s21 = scalar_lea.vmem %s1439_s20, 16 }
  0x58   : > { %418 = vperm.xlu1 %1024, %v389_v3   ;;  %394 = vperm.xlu0 %1023, %v389_v3   ;;  %v1038_v40 = vld [vmem:[#allocation5 + $0x20] sm:$0xff]   ;;  %v1041_v53 = vld [vmem:[#allocation5 + $0x38] sm:$0xff]   ;;  %p1099_p13 = scmp.ne.s32.totalorder %s1439_s20, %s1098_s21  ;;  %p1514_p8 = scmp.ne.s32.totalorder %s1505_s19, 0 }
  0x59   : > { %899 = vmatpush3.bf16.msra.mxu1 %v1027_v6  ;;  %922 = vmatprep.subr.bf16.mxu0 %v1192_v2  ;;  %v852_v42 = vld [vmem:[%s1488_s4] ss:$0 sm:$0xff]  ;;  %s1195_s12 = smov [#allocation7]  }
  0x5a   : > { %900 = vmatprep.subr.bf16.mxu1 %v1192_v2  ;;  %v858_v54 = vld [vmem:[%s1490_s6] ss:$0 sm:$0xff]  ;;  %p1100_p10 = pnand %p1099_p13, %p1514_p8  ;;  %s1102_s22 = sshll.u32 %s1195_s12, 4  ;;  %s1103_s22 = int_to_ptr.vmem [resolvable:$false] %s1102_s22 }
  0x5b   : > { %923 = vmatpush3.bf16.msra.mxu0 %v1035_v37  ;;  %v864_v1 = vld [vmem:[%s1492_s8] ss:$0 sm:$0xff]  ;;  %s1104_s23 = scalar_lea.vmem %s1103_s22, 32  ;;  %p1105_p2 = scmp.lt.s32.totalorder %s1439_s20, %s1103_s22 }
  0x5c   : > { %422 = vperm.xlu1 %1024, %v390_v5   ;;  %399 = vperm.xlu0 %1023, %v390_v5   ;;  %p1101_p11 = pneg %p1100_p10  ;;  %p1106_p3 = scmp.lt.s32.totalorder %s1104_s23, %s1098_s21 }
  0x5d   : > { %901 = vmatpush3.bf16.msra.mxu1 %v1028_v7  ;;  %924 = vmatprep.subr.bf16.mxu0 %v1192_v2 }
  0x5e   : > { %902 = vmatprep.subr.bf16.mxu1 %v1192_v2  ;;  %p1107_p5 = por %p1106_p3, %p1105_p2 }
  0x5f   : > { %925 = vmatpush3.bf16.msra.mxu0 %v1036_v38 }
  0x60   : > { %1025 = vset.pattern.permute.xlu0 %v1190_v0  ;;  %926 = vmatprep.subr.bf16.mxu0 %v1192_v2  ;;  %v1194_v0 = vmov -inf   ;;  %p1108_p6 = pnand %p1107_p5, %p1101_p11 }
  0x61   : > { %903 = vmatpush3.bf16.msra.mxu1 %v1029_v8  ;;  %725 = vst [vmem:[%s377_s15] sm:$0x1] %v1194_v0 }
  0x62   : > { %908 = vmatprep.subr.bf16.mxu1 %v1192_v2 }
  0x63   : > { %927 = vmatpush3.bf16.msra.mxu0 %v1037_v39 }
  0x64   : > { %928 = vmatprep.subr.bf16.mxu0 %v1192_v2 }
  0x67   : > { %929 = vmatpush3.bf16.msra.mxu0 %v1038_v40 }
  0x68   : > { %930 = vmatprep.subr.bf16.mxu0 %v1192_v2 }
  0x6b   : > { %931 = vmatpush3.bf16.msra.mxu0 %v1039_v41 }
  0x6c   : > { %932 = vmatprep.subr.bf16.mxu0 %v1192_v2 }
  0x6f   : > { %933 = vmatpush3.bf16.msra.mxu0 %v1040_v52 }
  0x70   : > { %934 = vmatprep.subr.bf16.mxu0 %v1192_v2 }
  0x73   : > { %935 = vmatpush3.bf16.msra.mxu0 %v1041_v53 }
  0xd7   : > { %v419_v16 = vpop.permute.xlu1 %418  ;;  %v395_v18 = vpop.permute.xlu0 %394 }
  0xd8   : > { %v406_v19 = vmul.f32 %v405_v14, %v395_v18  ;;  %v429_v20 = vmul.f32 %v428_v15, %v419_v16 }
  0xda   : > { %v415_v21 = vadd.f32 %v851_v17, %v406_v19 }
  0xdb   : > { %v423_v22 = vpop.permute.xlu1 %422  ;;  %v400_v23 = vpop.permute.xlu0 %399 }
  0xdc   : > { %v407_v24 = vmul.f32 %v405_v14, %v400_v23  ;;  %v431_v25 = vadd.f32 %v429_v20, %v415_v21  ;;  %v430_v26 = vmul.f32 %v428_v15, %v423_v22  ;;  %v726_v14 = vld [vmem:[%s377_s15] sm:$0x1] }
  0xde   : > { %v416_v27 = vadd.f32 %v851_v17, %v407_v24  ;;  %v433_v29 = vmax.f32 %v431_v25, 0.0 }
  0xe0   : > { %v432_v28 = vadd.f32 %v430_v26, %v416_v27 }
  0xe2   : > { %v434_v30 = vmax.f32 %v432_v28, 0.0 }
  0xe4   : > { %v435_v32 = vpack.c.bf16 %v434_v30, %v433_v29 }
  0xe6   : > { %905 = vmatmul.mubr.msk.bf16.vlgmr.msra.gmra.mrb[0].mxu1 %vm475_vm1, %v435_v32 }
  0xe7   : > { %909 = vmatpush3.bf16.msra.mxu1 %v1030_v31  ;;  %916 = vmatprep.mubr.msk.bf16.mxu1 %vm1193_vm0, %v1192_v2 }
  0xe8   : > { %910 = vmatprep.subr.bf16.mxu1 %v1192_v2 }
  0xeb   : > { %911 = vmatpush3.bf16.msra.mxu1 %v1031_v33 }
  0xec   : > { %912 = vmatprep.subr.bf16.mxu1 %v1192_v2 }
  0xef   : > { %913 = vmatpush3.bf16.msra.mxu1 %v1032_v34 }
  0xf0   : > { %914 = vmatprep.subr.bf16.mxu1 %v1192_v2 }
  0xf3   : > { %915 = vmatpush3.bf16.msra.mxu1 %v1033_v35 }
 0x1b9   : > { %v513_v43 = vpop.f32.mrb[0].mxu1 }
 0x1ba   : > { %v514_v44 = vadd.f32 %v852_v42, %v513_v43  ;;  %v906_v45 = vpop.f32.mrb[1].mxu1 }
 0x1bb   : > { %v516_v46 = vpop.f32.mrb[2].mxu1 }
 0x1bc   : > { %v517_v47 = vadd.f32 %v852_v42, %v516_v46  ;;  %v907_v48 = vpop.f32.mrb[3].mxu1  ;;  %v520_v49 = vmax.f32 %v514_v44, 0.0 }
 0x1be   : > { %v521_v50 = vmax.f32 %v517_v47, 0.0 }
 0x1c0   : > { %v522_v51 = vpack.c.bf16 %v521_v50, %v520_v49 }
 0x1c2   : > { %917 = vmatmul.mubr.msk.bf16.vlgmr.msra.gmra.mrb[4].mxu1 %vm475_vm1, %v522_v51 }
 0x295   : > { %v599_v55 = vpop.f32.mrb[4].mxu1 }
 0x296   : > { %v600_v56 = vadd.f32 %v858_v54, %v599_v55  ;;  %v918_v57 = vpop.f32.mrb[5].mxu1 }
 0x297   : > { %v602_v58 = vpop.f32.mrb[6].mxu1 }
 0x298   : > { %v603_v59 = vadd.f32 %v858_v54, %v602_v58  ;;  %v919_v60 = vpop.f32.mrb[7].mxu1  ;;  %v606_v61 = vmax.f32 %v600_v56, 0.0 }
 0x29a   : > { %v607_v62 = vmax.f32 %v603_v59, 0.0 }
 0x29c   : > { %v608_v63 = vpack.c.bf16 %v607_v62, %v606_v61 }
 0x29e   : > { %937 = vmatmul.mubr.bf16.vlgmr.msra.gmra.mrb[0].mxu0 %v608_v63 }
 0x371   : > { %v714_v2 = vpop.f32.mrb[0].mxu0 }
 0x372   : > { %v938_v3 = vpop.f32.mrb[1].mxu0  ;;  %v715_v5 = vadd.f32 %v864_v1, %v714_v2 }
 0x373   : > { %v717_v4 = vpop.f32.mrb[2].mxu0 }
 0x374   : > { %v718_v6 = vadd.f32 %v864_v1, %v717_v4  ;;  %v939_v7 = vpop.f32.mrb[3].mxu0 }
 0x376   : > { %v727_v8 = vmax.f32 %v715_v5, %v718_v6 }
 0x378   : > { %v728_v9 = vrot.slane %v727_v8, 4 }
 0x37a   : > { %v729_v10 = vmax.f32 %v727_v8, %v728_v9 }
 0x37c   : > { %v730_v11 = vrot.slane %v729_v10, 2 }
 0x37e   : > { %v731_v12 = vmax.f32 %v729_v10, %v730_v11 }
 0x380   : > { %v732_v13 = vrot.slane %v731_v12, 1 }
 0x382   : > { %v733_v15 = vmax.f32 %v731_v12, %v732_v13 }
 0x384   : > { %v734_v16 = vmax.f32 %v726_v14, %v733_v15 }
 0x386   : > { %735 = vst [vmem:[%s377_s15] sm:$0x1] %v734_v16 }
 0x387   : > { %1111 = shalt.err (!%p1108_p6)
}
 0x388   : > { %s1112_s27 = scalar_lea.hbm %s1437_s26, 16  ;;  %s1116_s24 = scalar_lea.hbm %s1493_s9, 32 }
 0x389   : > { %p1113_p7 = scmp.ne.s32.totalorder %s1437_s26, %s1112_s27  ;;  %p1117_p0 = scmp.lt.u32.totalorder %s1437_s26, %s1493_s9 }
 0x38a   : > { %p1118_p4 = scmp.lt.u32.totalorder %s1116_s24, %s1112_s27  ;;  %p1120_p13 = scmp.lt.u32.totalorder %s1112_s27, %s1437_s26 }
 0x38b   : > { %p1114_p9 = pnand %p1113_p7, %p1514_p8 }
 0x38c   : > { %p1119_p1 = por %p1118_p4, %p1117_p0 }
 0x38d   : > { %p1115_p12 = pneg %p1114_p9 }
 0x38e   : > { %p1121_p10 = por %p1120_p13, %p1119_p1 }
 0x390   : > { %p1122_p11 = pnand %p1121_p10, %p1115_p12 }
 0x392   : > { %1125 = shalt.err (!%p1122_p11)
}
 0x393   : > { %948 = dma.vmem_to_hbm [thread:$0]  (%p1514_p8), %s1439_s20, 16, %s1437_s26, %s737_s11  }
 0x394 PF: > { %s1515_s16 = sld [smem:[#allocation14_spill]]  ;;  %p965_p2 = scmp.ge.s32.totalorder %s1184_s14, 2 }
 0x395   : > { %s761_s18 = sand.u32 1, %s1164_s30  }
 0x396   : > { %s762_s25 = scalar_lea.sflag [#allocation4], %s761_s18 }
 0x39a   : > { %p1516_p3 = scmp.ne.s32.totalorder %s1515_s16, 0 }
 0x39c   : > { %p958_p5 = pnand %p965_p2, %p1516_p3 }
 0x39e   : > { %1159 = dma.done.wait (!%p958_p5), %s762_s25, 16  }
 0x39f   : > { %1161 = vsyncadd (!%p958_p5), %s762_s25, 4294967280  ;;  %s24_s14 = sadd.s32 1, %s1184_s14   ;;  %s1517_s28 = sld [smem:[#allocation11_spill]] }
 0x3a0   : > { %p21_p6 = scmp.ge.s32.totalorder %s24_s14, 4   ;;  %s1518_s11 = sld [smem:[#allocation15_spill]] }
 0x3a1   : > { %s1519_s12 = sld [smem:[#allocation12_spill]]  ;;  %s1520_s13 = sld [smem:[#allocation13_spill]] }
 0x3a2   : > { %s1521_s30 = smov %s1168_s10  ;;  %23 = sbr.rel (!%p21_p6) target bundleno = 6 (0x6), region = 104 }
 0x3a5   : > { %s1522_s10 = smov %s1517_s28 }
 0x3a9   :  { %766 = vsyncpa [#allocation3], 1 }
 0x3aa   :  { %768 = vsyncpa [#allocation3 + $0x1], 1 }
 0x3ab   :  { %769 = vsyncpa [#allocation6], 1 }
 0x3ac   :  { %770 = vsyncpa [#allocation4], 1 }
 0x3ad   :  { %772 = vsyncpa [#allocation4 + $0x1], 1 }

</bundles_post_ra>
